<compile_context>
chip_gen: v6e
topology: v6e:2x2x1
jax: 0.10.0
libtpu: 0.0.40
codegen_flags: <defaults>
</compile_context>

<pallas_src>
import jax
import jax.numpy as jnp
from jax.experimental import pallas as pl
from jax.experimental.pallas import tpu as pltpu

_LANES = 128
_SUBLANES = 8


def _copy_kernel(src_ref, o_ref):
    # Pure DMA + copy: one (tile_r, cols) lane-dense block of the position
    # embedding slab per grid step.
    o_ref[...] = src_ref[...]


def _pick_row_tile(rows, cols, itemsize, max_block_bytes):
    """Largest row tile that is the full extent or a multiple of 8, divides
    `rows`, and keeps a single block under `max_block_bytes`."""
    if rows * cols * itemsize <= max_block_bytes:
        return rows  # whole slab in one full-extent block
    limit_rows = max(
        _SUBLANES,
        (max_block_bytes // (cols * itemsize)) // _SUBLANES * _SUBLANES,
    )
    t = limit_rows
    while t >= _SUBLANES:
        if rows % t == 0:
            return t
        t -= _SUBLANES
    # Fallback: no clean divisor — use one big block (rare; only for awkward
    # row counts that are both huge and not a multiple of 8).
    return rows


def position_wise_embedding(x, table, *, max_block_bytes=4 << 20):
    """Pallas equivalent of PositionWiseEmbedding.forward.

    Only x's shape matters (positions are arange(L)); returns
    pos_embedding(arange(L)) broadcast over the batch: (B, L, D).
    """
    B, L = x.shape[0], x.shape[1]
    max_len, D = table.shape
    assert L <= max_len, "sequence length must not exceed max_len"

    # The contiguous-arange "gather": rows 0..L-1 of the table (static slice).
    slab_src = table[:L]
    n = L * D
    itemsize = jnp.dtype(table.dtype).itemsize

    # Lane-dense view of the slab when possible (full 128-lane stores).
    if n % _LANES == 0:
        rows, cols = n // _LANES, _LANES
    else:
        # Lane-sparse fallback (masked stores) — still correct, just slower.
        rows, cols = L, D
    src2 = slab_src.reshape(rows, cols)

    tile_r = _pick_row_tile(rows, cols, itemsize, max_block_bytes)
    n_tiles = rows // tile_r
    block_bytes = tile_r * cols * itemsize
    # Double-buffered input + output blocks plus headroom; never below the
    # smallest per-generation default scoped limit (16 MiB on v5e).
    vmem_limit = max(4 * block_bytes + (2 << 20), 16 << 20)

    slab = pl.pallas_call(
        _copy_kernel,
        out_shape=jax.ShapeDtypeStruct((rows, cols), table.dtype),
        grid=(n_tiles,),
        in_specs=[pl.BlockSpec((tile_r, cols), lambda i: (i, 0))],
        out_specs=pl.BlockSpec((tile_r, cols), lambda i: (i, 0)),
        compiler_params=pltpu.CompilerParams(
            dimension_semantics=("parallel",),
            vmem_limit_bytes=vmem_limit,
        ),
    )(src2)

    # Batch broadcast stays in the XLA wrapper: emitting B identical copies
    # from the kernel would multiply HBM write traffic by B for redundant data.
    return jnp.broadcast_to(slab.reshape(L, D), (B, L, D))


if __name__ == "__main__":
    # Small shapes consistent with the module: vocab_size is unused by forward.
    batch_size = 2
    seq_len = 8
    embedding_dim = 32
    max_len = 16
    vocab_size = 100

    key = jax.random.PRNGKey(0)
    k_tab, k_x = jax.random.split(key)

    # Deterministic parameter init (nn.Embedding default ~ N(0,1)).
    pos_table = jax.random.normal(k_tab, (max_len, embedding_dim), dtype=jnp.float32)
    # Token ids: values are irrelevant to the forward pass, only the shape is used.
    x = jax.random.randint(k_x, (batch_size, seq_len), 0, vocab_size, dtype=jnp.int32)

    out = position_wise_embedding(x, pos_table)
    out = jax.block_until_ready(out)

    # Reference: pos_embedding(arange(L)) broadcast over batch.
    ref = jnp.broadcast_to(pos_table[:seq_len], (batch_size, seq_len, embedding_dim))

    assert out.shape == (batch_size, seq_len, embedding_dim), out.shape
    assert out.dtype == jnp.float32
    assert jnp.allclose(out, ref), "mismatch vs reference"
    print("KERNEL_OK")
</pallas_src>

<mosaic_0001>
module attributes {stable_mosaic.version = 11 : i64} {
  func.func @_copy_kernel(%arg0: i32, %arg1: memref<2x128xf32, #tpu.memory_space<vmem>>, %arg2: memref<2x128xf32, #tpu.memory_space<vmem>>) attributes {dimension_semantics = [#tpu.dimension_semantics<parallel>], iteration_bounds = array<i64: 1>, scalar_prefetch = 0 : i64, scratch_operands = 0 : i64, tpu.core_type = #tpu.core_type<tc>, window_params = [{transform_indices = @transform_0, window_bounds = array<i64: 2, 128>}, {transform_indices = @transform_1, window_bounds = array<i64: 2, 128>}]} {
    %c0 = arith.constant 0 : index
    %c0_0 = arith.constant 0 : index
    %0 = vector.load %arg1[%c0, %c0_0] : memref<2x128xf32, #tpu.memory_space<vmem>>, vector<2x128xf32>
    %c0_1 = arith.constant 0 : index
    %c0_2 = arith.constant 0 : index
    %1 = vector.load %arg2[%c0_1, %c0_2] : memref<2x128xf32, #tpu.memory_space<vmem>>, vector<2x128xf32>
    tpu.vector_store %arg2[%c0_1, %c0_2], %0 {strides = array<i32>} : memref<2x128xf32, #tpu.memory_space<vmem>>, vector<2x128xf32>,
    return
  }
  func.func @transform_0(%arg0: i32) -> (i32, i32) {
    %c0_i32 = arith.constant 0 : i32
    %c0_i32_0 = arith.constant 0 : i32
    return %arg0, %c0_i32 : i32, i32
  }
  func.func @transform_1(%arg0: i32) -> (i32, i32) {
    %c0_i32 = arith.constant 0 : i32
    %c0_i32_0 = arith.constant 0 : i32
    return %arg0, %c0_i32 : i32, i32
  }
}

</mosaic_0001>

<bundles_post_ra>
// kernel: tpu_custom_call.1
= control target key start
LH: loop header
LB: loop body
LE: loop exit
PB: predicated region body
PF: predicated region fallthrough
CT: control target
= control target key end

     0   :  { %6 = vsyncpa [#allocation3], 0  ;;  %s102_s0 = inlined_call_operand.hbm [shape: f32[2,128], index: 0, kind: input, shape index: {}]   ;;  %s103_s1 = inlined_call_operand.hbm [shape: f32[2,128], index: 1, kind: output, shape index: {}]  }
   0x1   :  { %7 = vsyncpa [#allocation4], 0  ;;  %s84_s6 = smov [#allocation2]  }
   0x2   :  { %s14_s7 = sshll.u32 %s84_s6, 4  ;;  %s15_s7 = int_to_ptr.vmem [resolvable:$true] %s14_s7 }
   0x3   :  { %s48_s8 = scalar_lea.vmem %s15_s7, 32  ;;  %p53_p1 = scmp.lt.s32.totalorder %s15_s7, %s15_s7 }
   0x4   :  { %p49_p0 = scmp.ne.s32.totalorder %s15_s7, %s48_s8  ;;  %p54_p2 = scmp.lt.s32.totalorder %s48_s8, %s48_s8 }
   0x6   :  { %p55_p3 = por %p54_p2, %p53_p1 }
   0x8   :  { %p56_p4 = pnand %p55_p3, %p49_p0 }
   0xa   :  { %59 = shalt.err (!%p56_p4)
}
   0xb   :  { %17 = dma.hbm_to_vmem [thread:$0]  %s102_s0, 32, %s15_s7, [#allocation3]  }
   0xc   :  { %80 = dma.done.wait [#allocation3], 32  }
   0xd   :  { %81 = vsyncadd [#allocation3], 4294967264  ;;  %s85_s11 = smov [#allocation5]   ;;  %v21_v0 = vld [vmem:[#allocation2] sm:$0x3] }
   0xe   :  { %s29_s12 = sshll.u32 %s85_s11, 4  ;;  %22 = vst [vmem:[#allocation5] sm:$0x3] %v21_v0  ;;  %s30_s12 = int_to_ptr.vmem [resolvable:$true] %s29_s12 }
   0xf   :  { %s60_s13 = scalar_lea.vmem %s30_s12, 32  ;;  %p65_p6 = scmp.lt.s32.totalorder %s30_s12, %s30_s12 }
  0x10   :  { %p61_p5 = scmp.ne.s32.totalorder %s30_s12, %s60_s13  ;;  %p66_p7 = scmp.lt.s32.totalorder %s60_s13, %s60_s13 }
  0x12   :  { %p67_p8 = por %p66_p7, %p65_p6 }
  0x14   :  { %p68_p9 = pnand %p67_p8, %p61_p5 }
  0x16   :  { %71 = shalt.err (!%p68_p9)
}
  0x17   :  { %32 = dma.vmem_to_hbm [thread:$0]  %s30_s12, 32, %s103_s1, [#allocation4]  }
  0x18   :  { %82 = dma.done.wait [#allocation4], 32  }
  0x19   :  { %83 = vsyncadd [#allocation4], 4294967264 }
  0x1a   :  { %36 = vsyncpa [#allocation3], 1 }
  0x1b   :  { %37 = vsyncpa [#allocation4], 1 }

</bundles_post_ra>
